<compile_context>
chip_gen: v5e
topology: v5e:2x2
jax: 0.10.0
libtpu: 0.0.40
codegen_flags: <defaults>
</compile_context>

<pallas_src>
import functools

import jax
import jax.numpy as jnp
from jax import lax
from jax.experimental import pallas as pl
from jax.experimental.pallas import tpu as pltpu


def _mlp_loss_kernel(x_ref, w1_ref, b1_ref, w2_ref, b2_ref, y_ref,
                     out_ref, psum_ref, *, n_total, tile_n):
    i = pl.program_id(0)

    x = x_ref[...]            # (TN, Din)   matmul dtype
    w1 = w1_ref[...]          # (H, Din)    matmul dtype (PyTorch Linear layout)
    b1 = b1_ref[...]          # (1, H)      f32
    w2 = w2_ref[...]          # (Dout, H)   matmul dtype
    b2 = b2_ref[...]          # (1, Dout)   f32
    y = y_ref[...]            # (TN, Dout)  f32

    # x @ W1^T and h @ W2^T: contract the last dims directly (no transposes).
    dn = (((1,), (1,)), ((), ()))
    h = lax.dot_general(x, w1, dimension_numbers=dn,
                        preferred_element_type=jnp.float32) + b1
    h = jnp.maximum(h, 0.0)                               # clamp(min=0), f32 VPU
    out = lax.dot_general(h.astype(w2.dtype), w2, dimension_numbers=dn,
                          preferred_element_type=jnp.float32) + b2
    out_ref[...] = out.astype(out_ref.dtype)

    # Per-tile partial sum of squared errors, broadcast into this tile's own
    # lane-dense (8,128) block (unmasked vst; wrapper reads [:, 0, 0]).
    diff = out - y
    psum_ref[...] = jnp.full(psum_ref.shape, jnp.sum(diff * diff), jnp.float32)

    # Ragged last tile only: redo the reduction with padded rows selected out.
    if n_total % tile_n != 0:
        @pl.when(i == pl.num_programs(0) - 1)
        def _():
            row = lax.broadcasted_iota(jnp.int32, diff.shape, 0) + i * tile_n
            d = jnp.where(row < n_total, diff, 0.0)   # select, not mask-multiply
            psum_ref[...] = jnp.full(psum_ref.shape, jnp.sum(d * d), jnp.float32)


def _default_vmem_limit_bytes():
    """Generation-aware scoped-VMEM limit: 64 MiB on v5e/v6e (128 MiB physical),
    ~48 MiB on v7x (64 MiB physical); conservative fallback if the query fails."""
    mib = 1024 * 1024
    try:
        cap = int(pltpu.get_tpu_info().vmem_capacity_bytes)
    except Exception:
        cap = 64 * mib
    if cap >= 100 * mib:          # v5e / v6e
        return 64 * mib
    return int(min(max(cap - 16 * mib, 32 * mib), 64 * mib))   # v7x: ~48 MiB


def _pick_batch_tile(n, tile_n, vmem_limit_bytes):
    """Cap the batch tile so the double-buffered, lane-padded x/y/out streams
    plus the f32 intermediates fit the scoped VMEM limit with headroom."""
    per_row = 3 * 2 * 128 * 4 + 2 * 128 * 4   # x/y/out (x2 buffers) + h/out f32
    budget = max(vmem_limit_bytes - 8 * 1024 * 1024, 8 * 1024 * 1024)
    cap = max((budget // per_row) // 8 * 8, 8)
    tn = min(int(tile_n), int(cap))
    return n if n <= tn else tn


def network_forward(x, y, w1, b1, w2, b2, reg_strength=0.0,
                    tile_n=8192, matmul_dtype=jnp.float32,
                    vmem_limit_bytes=None):
    """Mirrors Network.forward with lossFunction='MSE'.

    x: (N, Din), y: (N, Dout)
    w1: (H, Din), b1: (H,), w2: (Dout, H), b2: (Dout,)  (PyTorch Linear layout)
    Returns (output (N, Dout) f32, loss scalar f32).

    matmul_dtype=jnp.bfloat16 feeds bf16 MXU operands (f32 accumulate); only
    use it when x already arrives as bf16 upstream (a wrapper-side cast re-reads
    all of x from HBM and negates the bandwidth saving).
    """
    x = jnp.asarray(x)
    y = jnp.asarray(y, jnp.float32)
    w1f = jnp.asarray(w1, jnp.float32)
    b1f = jnp.asarray(b1, jnp.float32)
    w2f = jnp.asarray(w2, jnp.float32)
    b2f = jnp.asarray(b2, jnp.float32)

    n, din = x.shape
    hid = w1f.shape[0]
    dout = w2f.shape[0]

    if vmem_limit_bytes is None:
        vmem_limit_bytes = _default_vmem_limit_bytes()

    tn = _pick_batch_tile(n, tile_n, vmem_limit_bytes)
    num_tiles = pl.cdiv(n, tn)

    x_in = x if x.dtype == matmul_dtype else x.astype(matmul_dtype)
    w1_in = w1f.astype(matmul_dtype)
    w2_in = w2f.astype(matmul_dtype)
    b1r = b1f.reshape(1, hid)
    b2r = b2f.reshape(1, dout)

    kernel = functools.partial(_mlp_loss_kernel, n_total=n, tile_n=tn)

    bytes_accessed = (x_in.size * x_in.dtype.itemsize
                      + w1_in.size * w1_in.dtype.itemsize
                      + w2_in.size * w2_in.dtype.itemsize
                      + 4 * (b1r.size + b2r.size + y.size + n * dout
                             + num_tiles * 8 * 128))
    cost = pl.CostEstimate(flops=2 * n * (din * hid + hid * dout),
                           transcendentals=0,
                           bytes_accessed=int(bytes_accessed))

    out, psum = pl.pallas_call(
        kernel,
        out_shape=(
            jax.ShapeDtypeStruct((n, dout), jnp.float32),
            jax.ShapeDtypeStruct((num_tiles, 8, 128), jnp.float32),
        ),
        grid=(num_tiles,),
        in_specs=[
            pl.BlockSpec((tn, din), lambda i: (i, 0)),     # x: batch-tiled
            pl.BlockSpec((hid, din), lambda i: (0, 0)),    # w1: VMEM-resident
            pl.BlockSpec((1, hid), lambda i: (0, 0)),      # b1
            pl.BlockSpec((dout, hid), lambda i: (0, 0)),   # w2
            pl.BlockSpec((1, dout), lambda i: (0, 0)),     # b2
            pl.BlockSpec((tn, dout), lambda i: (i, 0)),    # y: batch-tiled
        ],
        out_specs=(
            pl.BlockSpec((tn, dout), lambda i: (i, 0)),       # output
            pl.BlockSpec((1, 8, 128), lambda i: (i, 0, 0)),   # per-tile SSE
        ),
        compiler_params=pltpu.CompilerParams(
            # No cross-step carry -> batch axis is parallel (2 TCs on v7x).
            dimension_semantics=("parallel",),
            vmem_limit_bytes=int(vmem_limit_bytes)),
        cost_estimate=cost,
    )(x_in, w1_in, b1r, w2_in, b2r, y)

    # Tiny epilogue: sum per-tile partials, scale once, add exact-f32 reg term
    # computed from the original (un-cast) weights.
    sse = jnp.sum(psum[:, 0, 0])
    param_val = (jnp.sum(w1f * w1f) + jnp.sum(b1f * b1f)
                 + jnp.sum(w2f * w2f) + jnp.sum(b2f * b2f))
    reg_term = (reg_strength / (din + 1 + din * (hid + 1))) * param_val
    loss = sse / (n * dout) + reg_term
    return out, loss


def _reference(x, y, w1, b1, w2, b2, reg_strength):
    h = jnp.maximum(x @ w1.T + b1, 0.0)
    out = h @ w2.T + b2
    param_val = (jnp.sum(b2 ** 2) + jnp.sum(w2 ** 2) +
                 jnp.sum(b1 ** 2) + jnp.sum(w1 ** 2))
    din, hid = w1.shape[1], w1.shape[0]
    reg_term = reg_strength / (din + 1 + din * (hid + 1)) * param_val
    loss = jnp.mean((out - y) ** 2) + reg_term
    return out, loss


if __name__ == "__main__":
    # Module-consistent small shapes: batch=8, inputDimension=16,
    # hiddenNode=32, outputDimension=4.
    N, DIN, HID, DOUT = 8, 16, 32, 4
    key = jax.random.PRNGKey(0)
    kx, ky, k1w, k1b, k2w, k2b, kx2, ky2 = jax.random.split(key, 8)

    x = jax.random.normal(kx, (N, DIN), jnp.float32)
    y = jax.random.normal(ky, (N, DOUT), jnp.float32)

    # Deterministic PyTorch-Linear-style init: U(-1/sqrt(fan_in), 1/sqrt(fan_in)).
    lim1 = 1.0 / jnp.sqrt(DIN)
    lim2 = 1.0 / jnp.sqrt(HID)
    w1 = jax.random.uniform(k1w, (HID, DIN), jnp.float32, -lim1, lim1)
    b1 = jax.random.uniform(k1b, (HID,), jnp.float32, -lim1, lim1)
    w2 = jax.random.uniform(k2w, (DOUT, HID), jnp.float32, -lim2, lim2)
    b2 = jax.random.uniform(k2b, (DOUT,), jnp.float32, -lim2, lim2)

    reg_strength = 0.1

    # Single-tile path (grid of 1).
    out, loss = network_forward(x, y, w1, b1, w2, b2, reg_strength)
    out, loss = jax.block_until_ready((out, loss))
    ref_out, ref_loss = _reference(x, y, w1, b1, w2, b2, reg_strength)
    assert jnp.allclose(out, ref_out, atol=1e-5, rtol=1e-5)
    assert jnp.allclose(loss, ref_loss, atol=1e-5, rtol=1e-5)

    # Multi-tile + ragged-tail + parallel-grid path: exercises the per-tile
    # SSE partials, the pl.when last-tile mask, and the wrapper-side reduce.
    N2 = 20
    x2 = jax.random.normal(kx2, (N2, DIN), jnp.float32)
    y2 = jax.random.normal(ky2, (N2, DOUT), jnp.float32)
    out2, loss2 = network_forward(x2, y2, w1, b1, w2, b2, reg_strength, tile_n=8)
    out2, loss2 = jax.block_until_ready((out2, loss2))
    ref_out2, ref_loss2 = _reference(x2, y2, w1, b1, w2, b2, reg_strength)
    assert jnp.allclose(out2, ref_out2, atol=1e-5, rtol=1e-5)
    assert jnp.allclose(loss2, ref_loss2, atol=1e-5, rtol=1e-5)

    print("KERNEL_OK")
</pallas_src>

<mosaic_0001>
module attributes {stable_mosaic.version = 11 : i64} {
  func.func @_mlp_loss_kernel(%arg0: i32, %arg1: memref<8x16xf32, #tpu.memory_space<vmem>>, %arg2: memref<32x16xf32, #tpu.memory_space<vmem>>, %arg3: memref<1x32xf32, #tpu.memory_space<vmem>>, %arg4: memref<4x32xf32, #tpu.memory_space<vmem>>, %arg5: memref<1x4xf32, #tpu.memory_space<vmem>>, %arg6: memref<8x4xf32, #tpu.memory_space<vmem>>, %arg7: memref<8x4xf32, #tpu.memory_space<vmem>>, %arg8: memref<1x8x128xf32, #tpu.memory_space<vmem>>) attributes {dimension_semantics = [#tpu.dimension_semantics<parallel>], iteration_bounds = array<i64: 1>, scalar_prefetch = 0 : i64, scratch_operands = 0 : i64, tpu.core_type = #tpu.core_type<tc>, window_params = [{transform_indices = @transform_0, window_bounds = array<i64: 8, 16>}, {pipeline_mode = #tpu.pipeline_mode<synchronous>, transform_indices = @transform_1, window_bounds = array<i64: 32, 16>}, {pipeline_mode = #tpu.pipeline_mode<synchronous>, transform_indices = @transform_2, window_bounds = array<i64: 1, 32>}, {pipeline_mode = #tpu.pipeline_mode<synchronous>, transform_indices = @transform_3, window_bounds = array<i64: 4, 32>}, {pipeline_mode = #tpu.pipeline_mode<synchronous>, transform_indices = @transform_4, window_bounds = array<i64: 1, 4>}, {transform_indices = @transform_5, window_bounds = array<i64: 8, 4>}, {transform_indices = @transform_6, window_bounds = array<i64: 8, 4>}, {transform_indices = @transform_7, window_bounds = array<i64: 1, 8, 128>}]} {
    %c0 = arith.constant 0 : index
    %c0_0 = arith.constant 0 : index
    %0 = vector.load %arg1[%c0, %c0_0] : memref<8x16xf32, #tpu.memory_space<vmem>>, vector<8x16xf32>
    %c0_1 = arith.constant 0 : index
    %c0_2 = arith.constant 0 : index
    %1 = vector.load %arg2[%c0_1, %c0_2] : memref<32x16xf32, #tpu.memory_space<vmem>>, vector<32x16xf32>
    %c0_3 = arith.constant 0 : index
    %c0_4 = arith.constant 0 : index
    %2 = vector.load %arg3[%c0_3, %c0_4] : memref<1x32xf32, #tpu.memory_space<vmem>>, vector<1x32xf32>
    %c0_5 = arith.constant 0 : index
    %c0_6 = arith.constant 0 : index
    %3 = vector.load %arg4[%c0_5, %c0_6] : memref<4x32xf32, #tpu.memory_space<vmem>>, vector<4x32xf32>
    %c0_7 = arith.constant 0 : index
    %c0_8 = arith.constant 0 : index
    %4 = vector.load %arg5[%c0_7, %c0_8] : memref<1x4xf32, #tpu.memory_space<vmem>>, vector<1x4xf32>
    %c0_9 = arith.constant 0 : index
    %c0_10 = arith.constant 0 : index
    %5 = vector.load %arg6[%c0_9, %c0_10] : memref<8x4xf32, #tpu.memory_space<vmem>>, vector<8x4xf32>
    %cst = arith.constant dense<0.000000e+00> : vector<8x32xf32>
    %6 = tpu.matmul %0, %1, %cst {dimension_numbers = #tpu.dot_dimension_numbers<[1], [1], [0], [0], [0, 0, 1, 0], [], []>} : vector<8x16xf32>, vector<32x16xf32>, vector<8x32xf32> -> vector<8x32xf32>
    %7 = vector.broadcast %2 : vector<1x32xf32> to vector<8x32xf32>
    %8 = arith.addf %6, %7 : vector<8x32xf32>
    %cst_11 = arith.constant 0.000000e+00 : f32
    %9 = vector.broadcast %cst_11 : f32 to vector<8x32xf32>
    %10 = arith.maximumf %8, %9 : vector<8x32xf32>
    %cst_12 = arith.constant dense<0.000000e+00> : vector<8x4xf32>
    %11 = tpu.matmul %10, %3, %cst_12 {dimension_numbers = #tpu.dot_dimension_numbers<[1], [1], [0], [0], [0, 0, 1, 0], [], []>} : vector<8x32xf32>, vector<4x32xf32>, vector<8x4xf32> -> vector<8x4xf32>
    %12 = vector.broadcast %4 : vector<1x4xf32> to vector<8x4xf32>
    %13 = arith.addf %11, %12 : vector<8x4xf32>
    %c0_13 = arith.constant 0 : index
    %c0_14 = arith.constant 0 : index
    %14 = vector.load %arg7[%c0_13, %c0_14] : memref<8x4xf32, #tpu.memory_space<vmem>>, vector<8x4xf32>
    tpu.vector_store %arg7[%c0_13, %c0_14], %13 {strides = array<i32>} : memref<8x4xf32, #tpu.memory_space<vmem>>, vector<8x4xf32>,
    %15 = arith.subf %13, %5 : vector<8x4xf32>
    %16 = arith.mulf %15, %15 : vector<8x4xf32>
    %17 = vector.shape_cast %16 : vector<8x4xf32> to vector<1x8x4xf32>
    %cst_15 = arith.constant dense<0.000000e+00> : vector<1xf32>
    %18 = vector.multi_reduction <add>, %17, %cst_15 [1, 2] : vector<1x8x4xf32> to vector<1xf32>
    %19 = vector.shape_cast %18 : vector<1xf32> to vector<1x1x1xf32>
    %20 = vector.extract %19[0, 0, 0] : f32 from vector<1x1x1xf32>
    %21 = vector.broadcast %20 : f32 to vector<1x8x128xf32>
    %c0_16 = arith.constant 0 : index
    %c0_17 = arith.constant 0 : index
    %c0_18 = arith.constant 0 : index
    %22 = vector.load %arg8[%c0_16, %c0_17, %c0_18] : memref<1x8x128xf32, #tpu.memory_space<vmem>>, vector<1x8x128xf32>
    tpu.vector_store %arg8[%c0_16, %c0_17, %c0_18], %21 {strides = array<i32>} : memref<1x8x128xf32, #tpu.memory_space<vmem>>, vector<1x8x128xf32>,
    return
  }
  func.func @transform_0(%arg0: i32) -> (i32, i32) {
    %c0_i32 = arith.constant 0 : i32
    %c0_i32_0 = arith.constant 0 : i32
    return %arg0, %c0_i32 : i32, i32
  }
  func.func @transform_1(%arg0: i32) -> (i32, i32) {
    %c0_i32 = arith.constant 0 : i32
    %c0_i32_0 = arith.constant 0 : i32
    %c0_i32_1 = arith.constant 0 : i32
    return %c0_i32, %c0_i32_0 : i32, i32
  }
  func.func @transform_2(%arg0: i32) -> (i32, i32) {
    %c0_i32 = arith.constant 0 : i32
    %c0_i32_0 = arith.constant 0 : i32
    %c0_i32_1 = arith.constant 0 : i32
    return %c0_i32, %c0_i32_0 : i32, i32
  }
  func.func @transform_3(%arg0: i32) -> (i32, i32) {
    %c0_i32 = arith.constant 0 : i32
    %c0_i32_0 = arith.constant 0 : i32
    %c0_i32_1 = arith.constant 0 : i32
    return %c0_i32, %c0_i32_0 : i32, i32
  }
  func.func @transform_4(%arg0: i32) -> (i32, i32) {
    %c0_i32 = arith.constant 0 : i32
    %c0_i32_0 = arith.constant 0 : i32
    %c0_i32_1 = arith.constant 0 : i32
    return %c0_i32, %c0_i32_0 : i32, i32
  }
  func.func @transform_5(%arg0: i32) -> (i32, i32) {
    %c0_i32 = arith.constant 0 : i32
    %c0_i32_0 = arith.constant 0 : i32
    return %arg0, %c0_i32 : i32, i32
  }
  func.func @transform_6(%arg0: i32) -> (i32, i32) {
    %c0_i32 = arith.constant 0 : i32
    %c0_i32_0 = arith.constant 0 : i32
    return %arg0, %c0_i32 : i32, i32
  }
  func.func @transform_7(%arg0: i32) -> (i32, i32, i32) {
    %c0_i32 = arith.constant 0 : i32
    %c0_i32_0 = arith.constant 0 : i32
    %c0_i32_1 = arith.constant 0 : i32
    return %arg0, %c0_i32, %c0_i32_0 : i32, i32, i32
  }
}

</mosaic_0001>

<bundles_post_ra>
// kernel: tpu_custom_call.1
= control target key start
LH: loop header
LB: loop body
LE: loop exit
PB: predicated region body
PF: predicated region fallthrough
CT: control target
= control target key end

     0   :  { %vm38_vm0 = vcmask 130048   ;;  %s253_s0 = inlined_call_operand.vmem [shape: f32[8,16], index: 0, kind: input, shape index: {}]   ;;  %s254_s1 = inlined_call_operand.vmem [shape: f32[32,16], index: 1, kind: input, shape index: {}]   ;;  %s255_s2 = inlined_call_operand.vmem [shape: f32[1,32], index: 2, kind: input, shape index: {}]   ;;  %s256_s3 = inlined_call_operand.vmem [shape: f32[4,32], index: 3, kind: input, shape index: {}]   ;;  %s257_s4 = inlined_call_operand.vmem [shape: f32[1,4], index: 4, kind: input, shape index: {}]   ;;  %s258_s5 = inlined_call_operand.vmem [shape: f32[8,4], index: 5, kind: input, shape index: {}]   ;;  %s259_s6 = inlined_call_operand.vmem [shape: f32[8,4], index: 6, kind: output, shape index: {0}]   ;;  %s260_s7 = inlined_call_operand.hbm [shape: f32[1,8,128], index: 7, kind: output, shape index: {1}]  }
   0x1   :  { %v30_v0 = vld [vmem:[%s254_s1 + $0x18] sm:$0xff]  ;;  %v29_v1 = vld [vmem:[%s254_s1 + $0x10] sm:$0xff] }
   0x2   :  { %141 = vmatpush.xpose.msk.msra.mxu0 %vm38_vm0, %v30_v0 }
   0x3   :  { %13 = vsyncpa [#allocation3], 0  ;;  %v28_v2 = vld [vmem:[%s254_s1 + $0x8] sm:$0xff]  ;;  %v27_v3 = vld [vmem:[%s254_s1] sm:$0xff]  ;;  %vm78_vm1 = vcmask 261120   ;;  %vm105_vm2 = vcmask 31744  }
   0x4   :  { %v26_v4 = vld [vmem:[%s253_s0] sm:$0xff]  ;;  %s130_s19 = sshll.u32 %s260_s7, 4  ;;  %s131_s19 = int_to_ptr.hbm [resolvable:$true] %s130_s19 }
   0x5   :  { %v32_v5 = vld [vmem:[%s256_s3] sm:$0xf] }
   0x6   :  { %142 = vmatpush.xpose.msk.msra.mxu0 %vm38_vm0, %v29_v1  ;;  %146 = vmatpush.xpose.msk.msra.mxu1 %vm78_vm1, %v32_v5  ;;  %v151_v6 = vld [vmem:[%s255_s2] ss:$0 sm:$0xff]  ;;  %s179_s2 = smov [#allocation2]  }
   0x7   :  { %v152_v10 = vld [vmem:[%s257_s4] ss:$0 sm:$0xff]  ;;  %s128_s4 = sshll.u32 %s179_s2, 4  ;;  %s129_s4 = int_to_ptr.vmem [resolvable:$true] %s128_s4 }
   0x8   :  { %v34_v12 = vld [vmem:[%s258_s5] sm:$0xff] }
   0xa   :  { %143 = vmatpush.xpose.msk.msra.mxu0 %vm38_vm0, %v28_v2 }
   0xe   :  { %144 = vmatpush.xpose.msk.msra.mxu0 %vm38_vm0, %v27_v3 }
  0x11   :  { %145 = vmatmul.msk.f32.vlgmr.msra.gmra.mxu0 %vm38_vm0, %v26_v4 }
  0x8e   :  { %v71_v7 = vpop.f32.mrf.mxu0 }
  0x8f   :  { %v72_v8 = vadd.f32 %v151_v6, %v71_v7 }
  0x91   :  { %v74_v9 = vmax.f32 %v72_v8, 0.0 }
  0x93   :  { %147 = vmatmul.msk.f32.vlgmr.msra.gmra.mxu1 %vm78_vm1, %v74_v9 }
 0x110   :  { %v102_v11 = vpop.f32.mrf.mxu1 }
 0x111   :  { %v103_v13 = vadd.f32 %v152_v10, %v102_v11 }
 0x113   :  { %106 = vst.msk [vmem:[%s259_s6] sm:$0xff] %vm105_vm2, %v103_v13  ;;  %v107_v14 = vsub.f32 %v103_v13, %v34_v12 }
 0x115   :  { %v108_v15 = vmul.f32 %v107_v14, %v107_v14 }
 0x117   :  { %v109_v16 = vsel %vm105_vm2, %v108_v15, 0.0 }
 0x118   :  { %110 = vadd.xlane.f32.xlu0 %v109_v16 }
 0x18b   :  { %v111_v17 = vpop.xlane.xlu0 %110 }
 0x18c   :  { %v112_v18 = vrot.slane %v111_v17, 4 }
 0x18e   :  { %v113_v19 = vadd.f32 %v112_v18, %v111_v17 }
 0x190   :  { %v114_v20 = vrot.slane %v113_v19, 2 }
 0x192   :  { %v115_v21 = vadd.f32 %v114_v20, %v113_v19 }
 0x194   :  { %v116_v22 = vrot.slane %v115_v21, 1 }
 0x196   :  { %v117_v23 = vadd.f32 %v116_v22, %v115_v21 }
 0x198   :  { %148 = vpush %v117_v23 }
 0x1c9   :  { %s149_s6 = spop %148 }
 0x1ca   :  { %v119_v24 = vstv %s149_s6 }
 0x1cb   :  { %120 = vst [vmem:[#allocation2] sm:$0xff] %v119_v24 }
 0x1cc   :  { %133 = dma.vmem_to_hbm [thread:$0]  %s129_s4, 128, %s131_s19, [#allocation3]  }
 0x1cd   :  { %177 = dma.done.wait [#allocation3], 128  }
 0x1ce   :  { %178 = vsyncadd [#allocation3], 4294967168 }
 0x1cf   :  { %140 = vsyncpa [#allocation3], 1 }

</bundles_post_ra>
